<compile_context>
chip_gen: v7x
topology: tpu7x:2x2x1
jax: 0.10.0
libtpu: 0.0.40
codegen_flags: <defaults>
</compile_context>

<pallas_src>
import functools

import jax
import jax.numpy as jnp
from jax.experimental import pallas as pl
from jax.experimental.pallas import tpu as pltpu

N_INPUTS = 4
N_HIDDEN = 20
N_CLASSES = 3
N_OUT_SUB = 8            # classes padded 3 -> 8 along the sublane axis
DEFAULT_TB = 65536       # lane-axis (batch) tile: x 1 MiB + out 2 MiB per buffer,
                         # ~6 MiB double-buffered -> fits v5e/v6e/v7x scoped VMEM.


def _round_up(n, m):
    return ((n + m - 1) // m) * m


def _choose_tb(batch, tb_max):
    """Pick the lane-axis batch tile (multiple of 128)."""
    bp = _round_up(max(batch, 1), 128)
    if bp <= 256:
        # Tiny batch: single tile, single grid step.
        return bp
    # Aim for >= 2 grid steps (so v7x megacore can split the 'parallel' axis)
    # while keeping tiles as large as possible to amortize per-step overhead.
    half = _round_up((bp + 1) // 2, 128)
    return min(tb_max, half)


def mlp_kernel(xT_ref, w1_ref, b1_ref, w2_ref, b2_ref, oT_ref):
    xT = xT_ref[...]            # (4, TB)    lane-dense input tile
    w1 = w1_ref[...]            # (20, 4)    PyTorch (out, in) layout

    # fc1 as 4 unrolled VPU broadcast-FMAs (K=4 is far too small for the MXU):
    #   hT = W1 @ xT + b1  ==  sum_k W1[:, k] * xT[k, :] + b1
    h = b1_ref[...]             # (20, 1) -> broadcasts to (20, TB)
    for k in range(N_INPUTS):
        h = h + w1[:, k:k + 1] * xT[k:k + 1, :]
    h = jnp.tanh(h)             # EUP slot (overlaps with VPU/MXU work)

    # fc2 on the MXU: (8, 20) @ (20, TB) -> (8, TB), classes in sublanes 0..2.
    yT = jnp.dot(w2_ref[...], h, preferred_element_type=jnp.float32)
    oT_ref[...] = (yT + b2_ref[...]).astype(oT_ref.dtype)


def prepare_params(w1, b1, w2, b2):
    """One-time (outside the hot path) reshape/pad of PyTorch-layout params.

    w1: (20, 4), b1: (20,), w2: (3, 20), b2: (3,)  -- nn.Linear (out, in) layout.
    """
    b1c = b1.reshape(N_HIDDEN, 1)
    w2p = jnp.zeros((N_OUT_SUB, N_HIDDEN), w2.dtype).at[:N_CLASSES, :].set(w2)
    b2p = jnp.zeros((N_OUT_SUB, 1), b2.dtype).at[:N_CLASSES, 0].set(b2)
    return w1, b1c, w2p, b2p


@functools.partial(jax.jit, static_argnames=("tb_max",))
def mlp_forward(x, w1, b1c, w2p, b2p, *, tb_max=DEFAULT_TB):
    """x: (B, n_inputs) float32. Returns (B, n_classes) float32."""
    B = x.shape[0]
    tb = _choose_tb(B, tb_max)
    Bp = _round_up(B, tb)

    # Transposed, lane-dense input: (4, Bp). Cheap relayout (16 B/row), fused in jit.
    xT = x.T
    if Bp != B:
        xT = jnp.pad(xT, ((0, 0), (0, Bp - B)))

    grid = (Bp // tb,)
    oT = pl.pallas_call(
        mlp_kernel,
        out_shape=jax.ShapeDtypeStruct((N_OUT_SUB, Bp), jnp.float32),
        grid=grid,
        in_specs=[
            pl.BlockSpec((N_INPUTS, tb), lambda i: (0, i)),          # xT tile (pipelined)
            pl.BlockSpec((N_HIDDEN, N_INPUTS), lambda i: (0, 0)),    # w1 resident
            pl.BlockSpec((N_HIDDEN, 1), lambda i: (0, 0)),           # b1 resident
            pl.BlockSpec((N_OUT_SUB, N_HIDDEN), lambda i: (0, 0)),   # w2 (padded) resident
            pl.BlockSpec((N_OUT_SUB, 1), lambda i: (0, 0)),          # b2 (padded) resident
        ],
        out_specs=pl.BlockSpec((N_OUT_SUB, tb), lambda i: (0, i)),   # lane-dense output
        compiler_params=pltpu.CompilerParams(
            dimension_semantics=("parallel",)),                      # v7x: shard over 2 TCs
    )(xT, w1, b1c, w2p, b2p)

    # Padded class rows (3..7) and padded batch columns are dropped here; this
    # slice/transpose is fused inside the jit (reads 32 B/row, writes 12 B/row).
    return oT[:N_CLASSES, :B].T


def init_params(key):
    """Deterministic init in native PyTorch nn.Linear (out, in) layout."""
    k1, k2, k3, k4 = jax.random.split(key, 4)
    bound1 = 1.0 / (N_INPUTS ** 0.5)
    bound2 = 1.0 / (N_HIDDEN ** 0.5)
    w1 = jax.random.uniform(k1, (N_HIDDEN, N_INPUTS), jnp.float32,
                            minval=-bound1, maxval=bound1)
    b1 = jax.random.uniform(k2, (N_HIDDEN,), jnp.float32,
                            minval=-bound1, maxval=bound1)
    w2 = jax.random.uniform(k3, (N_CLASSES, N_HIDDEN), jnp.float32,
                            minval=-bound2, maxval=bound2)
    b2 = jax.random.uniform(k4, (N_CLASSES,), jnp.float32,
                            minval=-bound2, maxval=bound2)
    return w1, b1, w2, b2


def _ref_forward(x, w1, b1, w2, b2):
    # Matches PyTorch: fc2(tanh(fc1(x))) with nn.Linear (out, in) weights.
    return jnp.tanh(x @ w1.T + b1) @ w2.T + b2


if __name__ == "__main__":
    key = jax.random.PRNGKey(0)
    kx, kx2, kp = jax.random.split(key, 3)
    w1, b1, w2, b2 = init_params(kp)
    prepared = prepare_params(w1, b1, w2, b2)

    # Small-shape check (batch = 8, matching Iris-style usage).
    batch = 8
    x = jax.random.normal(kx, (batch, N_INPUTS), dtype=jnp.float32)
    out = jax.block_until_ready(mlp_forward(x, *prepared))
    ref = _ref_forward(x, w1, b1, w2, b2)
    assert out.shape == (batch, N_CLASSES)
    assert jnp.allclose(out, ref, atol=1e-5, rtol=1e-5)

    # Exercise the multi-step grid (>=2 steps for v7x megacore) + batch padding.
    batch2 = 1000
    x2 = jax.random.normal(kx2, (batch2, N_INPUTS), dtype=jnp.float32)
    out2 = jax.block_until_ready(mlp_forward(x2, *prepared))
    ref2 = _ref_forward(x2, w1, b1, w2, b2)
    assert out2.shape == (batch2, N_CLASSES)
    assert jnp.allclose(out2, ref2, atol=1e-5, rtol=1e-5)

    print("KERNEL_OK")
</pallas_src>

<mosaic_0001>
module attributes {stable_mosaic.version = 11 : i64} {
  func.func @mlp_kernel(%arg0: i32, %arg1: memref<4x128xf32, #tpu.memory_space<vmem>>, %arg2: memref<20x4xf32, #tpu.memory_space<vmem>>, %arg3: memref<20x1xf32, #tpu.memory_space<vmem>>, %arg4: memref<8x20xf32, #tpu.memory_space<vmem>>, %arg5: memref<8x1xf32, #tpu.memory_space<vmem>>, %arg6: memref<8x128xf32, #tpu.memory_space<vmem>>) attributes {dimension_semantics = [#tpu.dimension_semantics<parallel>], iteration_bounds = array<i64: 1>, scalar_prefetch = 0 : i64, scratch_operands = 0 : i64, tpu.core_type = #tpu.core_type<tc>, window_params = [{transform_indices = @transform_0, window_bounds = array<i64: 4, 128>}, {pipeline_mode = #tpu.pipeline_mode<synchronous>, transform_indices = @transform_1, window_bounds = array<i64: 20, 4>}, {pipeline_mode = #tpu.pipeline_mode<synchronous>, transform_indices = @transform_2, window_bounds = array<i64: 20, 1>}, {pipeline_mode = #tpu.pipeline_mode<synchronous>, transform_indices = @transform_3, window_bounds = array<i64: 8, 20>}, {pipeline_mode = #tpu.pipeline_mode<synchronous>, transform_indices = @transform_4, window_bounds = array<i64: 8, 1>}, {transform_indices = @transform_5, window_bounds = array<i64: 8, 128>}]} {
    %c0 = arith.constant 0 : index
    %c0_0 = arith.constant 0 : index
    %0 = vector.load %arg1[%c0, %c0_0] : memref<4x128xf32, #tpu.memory_space<vmem>>, vector<4x128xf32>
    %c0_1 = arith.constant 0 : index
    %c0_2 = arith.constant 0 : index
    %1 = vector.load %arg2[%c0_1, %c0_2] : memref<20x4xf32, #tpu.memory_space<vmem>>, vector<20x4xf32>
    %c0_3 = arith.constant 0 : index
    %c0_4 = arith.constant 0 : index
    %2 = vector.load %arg3[%c0_3, %c0_4] : memref<20x1xf32, #tpu.memory_space<vmem>>, vector<20x1xf32>
    %3 = vector.extract_strided_slice %1 {offsets = [0, 0], sizes = [20, 1], strides = [1, 1]} : vector<20x4xf32> to vector<20x1xf32>
    %4 = vector.extract_strided_slice %0 {offsets = [0, 0], sizes = [1, 128], strides = [1, 1]} : vector<4x128xf32> to vector<1x128xf32>
    %5 = vector.broadcast %3 : vector<20x1xf32> to vector<20x128xf32>
    %6 = vector.broadcast %4 : vector<1x128xf32> to vector<20x128xf32>
    %7 = arith.mulf %5, %6 : vector<20x128xf32>
    %8 = vector.broadcast %2 : vector<20x1xf32> to vector<20x128xf32>
    %9 = arith.addf %8, %7 : vector<20x128xf32>
    %10 = vector.extract_strided_slice %1 {offsets = [0, 1], sizes = [20, 1], strides = [1, 1]} : vector<20x4xf32> to vector<20x1xf32>
    %11 = vector.extract_strided_slice %0 {offsets = [1, 0], sizes = [1, 128], strides = [1, 1]} : vector<4x128xf32> to vector<1x128xf32>
    %12 = vector.broadcast %10 : vector<20x1xf32> to vector<20x128xf32>
    %13 = vector.broadcast %11 : vector<1x128xf32> to vector<20x128xf32>
    %14 = arith.mulf %12, %13 : vector<20x128xf32>
    %15 = arith.addf %9, %14 : vector<20x128xf32>
    %16 = vector.extract_strided_slice %1 {offsets = [0, 2], sizes = [20, 1], strides = [1, 1]} : vector<20x4xf32> to vector<20x1xf32>
    %17 = vector.extract_strided_slice %0 {offsets = [2, 0], sizes = [1, 128], strides = [1, 1]} : vector<4x128xf32> to vector<1x128xf32>
    %18 = vector.broadcast %16 : vector<20x1xf32> to vector<20x128xf32>
    %19 = vector.broadcast %17 : vector<1x128xf32> to vector<20x128xf32>
    %20 = arith.mulf %18, %19 : vector<20x128xf32>
    %21 = arith.addf %15, %20 : vector<20x128xf32>
    %22 = vector.extract_strided_slice %1 {offsets = [0, 3], sizes = [20, 1], strides = [1, 1]} : vector<20x4xf32> to vector<20x1xf32>
    %23 = vector.extract_strided_slice %0 {offsets = [3, 0], sizes = [1, 128], strides = [1, 1]} : vector<4x128xf32> to vector<1x128xf32>
    %24 = vector.broadcast %22 : vector<20x1xf32> to vector<20x128xf32>
    %25 = vector.broadcast %23 : vector<1x128xf32> to vector<20x128xf32>
    %26 = arith.mulf %24, %25 : vector<20x128xf32>
    %27 = arith.addf %21, %26 : vector<20x128xf32>
    %28 = math.tanh %27 : vector<20x128xf32>
    %c0_5 = arith.constant 0 : index
    %c0_6 = arith.constant 0 : index
    %29 = vector.load %arg4[%c0_5, %c0_6] : memref<8x20xf32, #tpu.memory_space<vmem>>, vector<8x20xf32>
    %cst = arith.constant dense<0.000000e+00> : vector<8x128xf32>
    %30 = tpu.matmul %29, %28, %cst {dimension_numbers = #tpu.dot_dimension_numbers<[1], [0], [0], [1], [0, 0, 1, 1], [], []>} : vector<8x20xf32>, vector<20x128xf32>, vector<8x128xf32> -> vector<8x128xf32>
    %c0_7 = arith.constant 0 : index
    %c0_8 = arith.constant 0 : index
    %31 = vector.load %arg5[%c0_7, %c0_8] : memref<8x1xf32, #tpu.memory_space<vmem>>, vector<8x1xf32>
    %32 = vector.broadcast %31 : vector<8x1xf32> to vector<8x128xf32>
    %33 = arith.addf %30, %32 : vector<8x128xf32>
    %c0_9 = arith.constant 0 : index
    %c0_10 = arith.constant 0 : index
    %34 = vector.load %arg6[%c0_9, %c0_10] : memref<8x128xf32, #tpu.memory_space<vmem>>, vector<8x128xf32>
    tpu.vector_store %arg6[%c0_9, %c0_10], %33 {strides = array<i32>} : memref<8x128xf32, #tpu.memory_space<vmem>>, vector<8x128xf32>,
    return
  }
  func.func @transform_0(%arg0: i32) -> (i32, i32) {
    %c0_i32 = arith.constant 0 : i32
    %c0_i32_0 = arith.constant 0 : i32
    return %c0_i32, %arg0 : i32, i32
  }
  func.func @transform_1(%arg0: i32) -> (i32, i32) {
    %c0_i32 = arith.constant 0 : i32
    %c0_i32_0 = arith.constant 0 : i32
    %c0_i32_1 = arith.constant 0 : i32
    return %c0_i32, %c0_i32_0 : i32, i32
  }
  func.func @transform_2(%arg0: i32) -> (i32, i32) {
    %c0_i32 = arith.constant 0 : i32
    %c0_i32_0 = arith.constant 0 : i32
    %c0_i32_1 = arith.constant 0 : i32
    return %c0_i32, %c0_i32_0 : i32, i32
  }
  func.func @transform_3(%arg0: i32) -> (i32, i32) {
    %c0_i32 = arith.constant 0 : i32
    %c0_i32_0 = arith.constant 0 : i32
    %c0_i32_1 = arith.constant 0 : i32
    return %c0_i32, %c0_i32_0 : i32, i32
  }
  func.func @transform_4(%arg0: i32) -> (i32, i32) {
    %c0_i32 = arith.constant 0 : i32
    %c0_i32_0 = arith.constant 0 : i32
    %c0_i32_1 = arith.constant 0 : i32
    return %c0_i32, %c0_i32_0 : i32, i32
  }
  func.func @transform_5(%arg0: i32) -> (i32, i32) {
    %c0_i32 = arith.constant 0 : i32
    %c0_i32_0 = arith.constant 0 : i32
    return %c0_i32, %arg0 : i32, i32
  }
}

</mosaic_0001>

<bundles_post_ra>
// kernel: mlp_forward.1
= control target key start
LH: loop header
LB: loop body
LE: loop exit
PB: predicated region body
PF: predicated region fallthrough
CT: control target
= control target key end

     0   :  { %v272_v0 = vmov 0   ;;  %v273_v5 = vmov 1   ;;  %v274_v6 = vmov 2   ;;  %v275_v8 = vmov 3   ;;  %s339_s2 = inlined_call_operand.vmem [shape: f32[20,1], index: 2, kind: input, shape index: {}]   ;;  %s340_s1 = inlined_call_operand.vmem [shape: f32[20,4], index: 1, kind: input, shape index: {}]   ;;  %s341_s4 = inlined_call_operand.vmem [shape: f32[8,1], index: 4, kind: input, shape index: {}]   ;;  %s342_s0 = inlined_call_operand.vmem [shape: f32[4,128], index: 0, kind: input, shape index: {}]   ;;  %s343_s3 = inlined_call_operand.vmem [shape: f32[8,20], index: 3, kind: input, shape index: {}]   ;;  %s344_s5 = inlined_call_operand.vmem [shape: f32[8,128], index: 5, kind: output, shape index: {}]  }
   0x1   :  { %252 = vset.pattern.permute.xlu1 %v272_v0  ;;  %251 = vset.pattern.permute.xlu0 %v272_v0  ;;  %v24_v1 = vld [vmem:[%s339_s2] sm:$0xff]  ;;  %v25_v3 = vld [vmem:[%s339_s2 + $0x8] sm:$0xff]  ;;  %v23_v7 = vld [vmem:[%s340_s1 + $0x10] sm:$0xf]  ;;  %v276_v10 = vmov 0.0|0.0   ;;  %vm277_vm0 = vmmov 0   ;;  %v42_v14 = vlaneseq }
   0x2   :  { %v21_v2 = vld [vmem:[%s340_s1] sm:$0xff]  ;;  %51 = vperm.xlu1 %252, %v24_v1   ;;  %v22_v4 = vld [vmem:[%s340_s1 + $0x8] sm:$0xff]  ;;  %v26_v9 = vld [vmem:[%s339_s2 + $0x10] sm:$0xf]  ;;  %241 = vmatprep.subr.bf16.mxu0 %v276_v10  ;;  %v278_v11 = vmov 0.0   ;;  %vm147_vm1 = vcmask 1043456  }
   0x3   :  { %29 = vperm.xlu0 %251, %v21_v2   ;;  %238 = vmatprep.mubr.msk.f32.mxu0 %vm277_vm0, %v278_v11  ;;  %v137_v12 = vld [vmem:[%s341_s4] sm:$0xff]  ;;  %v43_v16 = vshrl.u32 %v42_v14, 7  ;;  %vm143_vm2 = vcmask 162816  }
   0x4   :  { %v20_v21 = vld [vmem:[%s342_s0] sm:$0xf] }
   0x5   :  { %v44_v19 = vsub.s32 0, %v43_v16  ;;  %v81_v20 = vsub.s32 1, %v43_v16  ;;  %v103_v24 = vsub.s32 2, %v43_v16  ;;  %v125_v27 = vsub.s32 3, %v43_v16 }
   0x6   :  { %56 = vperm.xlu1 %252, %v25_v3  }
   0x7   :  { %34 = vperm.xlu0 %251, %v22_v4   ;;  %v45_v25 = vrot.slane %v20_v21, %v44_v19  ;;  %v82_v26 = vrot.slane %v20_v21, %v81_v20  ;;  %v104_v30 = vrot.slane %v20_v21, %v103_v24  ;;  %v126_v33 = vrot.slane %v20_v21, %v125_v27 }
   0xa   :  { %254 = vset.pattern.permute.xlu1 %v273_v5 }
   0xb   :  { %253 = vset.pattern.permute.xlu0 %v273_v5  ;;  %72 = vperm.xlu1 %254, %v22_v4  }
   0xc   :  { %68 = vperm.xlu0 %253, %v21_v2  }
   0xf   :  { %255 = vset.pattern.permute.xlu1 %v274_v6 }
  0x10   :  { %256 = vset.pattern.permute.xlu0 %v274_v6  ;;  %90 = vperm.xlu1 %255, %v21_v2  }
  0x11   :  { %94 = vperm.xlu0 %256, %v22_v4  }
  0x14   :  { %257 = vset.pattern.permute.xlu1 %v272_v0 }
  0x15   :  { %259 = vset.pattern.permute.xlu0 %v275_v8  ;;  %39 = vperm.xlu1 %257, %v23_v7  }
  0x16   :  { %116 = vperm.xlu0 %259, %v22_v4  }
  0x19   :  { %258 = vset.pattern.permute.xlu1 %v275_v8 }
  0x1a   :  { %262 = vset.pattern.permute.xlu0 %v274_v6  ;;  %112 = vperm.xlu1 %258, %v21_v2   ;;  %v136_v2 = vld [vmem:[%s343_s3] sm:$0xff] }
  0x1b   :  { %98 = vperm.xlu0 %262, %v23_v7  }
  0x1e   :  { %260 = vset.pattern.permute.xlu1 %v272_v0 }
  0x1f   :  { %265 = vset.pattern.permute.xlu0 %v272_v0  ;;  %61 = vperm.xlu1 %260, %v26_v9  }
  0x23   :  { %261 = vset.pattern.permute.xlu1 %v273_v5 }
  0x24   :  { %76 = vperm.xlu1 %261, %v23_v7  }
  0x28   :  { %263 = vset.pattern.permute.xlu1 %v275_v8 }
  0x29   :  { %120 = vperm.xlu1 %263, %v23_v7  }
  0x2d   :  { %264 = vset.pattern.permute.xlu1 %v272_v0 }
  0x2e   :  { %140 = vperm.xlu1 %264, %v137_v12  }
  0x81   :  { %v52_v13 = vpop.permute.xlu1 %51 }
  0x82   :  { %v30_v15 = vpop.permute.xlu0 %29 }
  0x83   :  { %v46_v34 = vmul.f32 %v45_v25, %v30_v15 }
  0x85   :  { %v57_v17 = vpop.permute.xlu1 %56  ;;  %v64_v42 = vadd.f32 %v52_v13, %v46_v34 }
  0x86   :  { %v35_v18 = vpop.permute.xlu0 %34 }
  0x87   :  { %v47_v28 = vmul.f32 %v45_v25, %v35_v18 }
  0x89   :  { %v65_v35 = vadd.f32 %v57_v17, %v47_v28 }
  0x8a   :  { %v73_v22 = vpop.permute.xlu1 %72 }
  0x8b   :  { %v69_v23 = vpop.permute.xlu0 %68  ;;  %v84_v32 = vmul.f32 %v82_v26, %v73_v22 }
  0x8c   :  { %v83_v37 = vmul.f32 %v82_v26, %v69_v23 }
  0x8d   :  { %v87_v40 = vadd.f32 %v84_v32, %v65_v35 }
  0x8e   :  { %v86_v45 = vadd.f32 %v83_v37, %v64_v42 }
  0x8f   :  { %v91_v29 = vpop.permute.xlu1 %90 }
  0x90   :  { %v95_v31 = vpop.permute.xlu0 %94  ;;  %v105_v43 = vmul.f32 %v104_v30, %v91_v29 }
  0x91   :  { %v106_v36 = vmul.f32 %v104_v30, %v95_v31 }
  0x92   :  { %v108_v48 = vadd.f32 %v105_v43, %v86_v45 }
  0x93   :  { %v109_v44 = vadd.f32 %v106_v36, %v87_v40 }
  0x94   :  { %v40_v38 = vpop.permute.xlu1 %39 }
  0x95   :  { %v117_v39 = vpop.permute.xlu0 %116  ;;  %v48_v53 = vmul.f32 %v45_v25, %v40_v38 }
  0x96   :  { %v128_v41 = vmul.f32 %v126_v33, %v117_v39 }
  0x98   :  { %v131_v46 = vadd.f32 %v128_v41, %v109_v44 }
  0x99   :  { %v113_v47 = vpop.permute.xlu1 %112 }
  0x9a   :  { %v127_v49 = vmul.f32 %v126_v33, %v113_v47  ;;  %266 = vtanh.f32 %v131_v46  ;;  %v99_v52 = vpop.permute.xlu0 %98 }
  0x9b   :  { %v107_v57 = vmul.f32 %v104_v30, %v99_v52 }
  0x9c   :  { %v130_v50 = vadd.f32 %v127_v49, %v108_v48 }
  0x9e   :  { %268 = vtanh.f32 %v130_v50  ;;  %v62_v51 = vpop.permute.xlu1 %61 }
  0x9f   :  { %v66_v55 = vadd.f32 %v62_v51, %v48_v53 }
  0xa3   :  { %v77_v54 = vpop.permute.xlu1 %76 }
  0xa4   :  { %v85_v56 = vmul.f32 %v82_v26, %v77_v54  ;;  %v267_v59 = vpop.eup %266 }
  0xa6   :  { %v88_v58 = vadd.f32 %v85_v56, %v66_v55 }
  0xa8   :  { %v269_v60 = vpop.eup %268  ;;  %v110_v61 = vadd.f32 %v107_v57, %v88_v58  ;;  %v121_v62 = vpop.permute.xlu1 %120 }
  0xa9   :  { %v129_v63 = vmul.f32 %v126_v33, %v121_v62  ;;  %v242_v0 = vpack.c.bf16 %v267_v59, %v269_v60 }
  0xab   :  { %v132_v1 = vadd.f32 %v129_v63, %v110_v61  ;;  %243 = vmatpush3.bf16.msra.mxu0 %v242_v0 }
  0xac   :  { %236 = vmatprep.subr.mxu0 %v278_v11 }
  0xad   :  { %270 = vtanh.f32 %v132_v1  ;;  %v141_v4 = vpop.permute.xlu1 %140 }
  0xb7   :  { %v271_v3 = vpop.eup %270 }
  0xb8   :  { %237 = vmatpush3.msk.msra.mxu0 %vm147_vm1, %v271_v3 }
  0xb9   :  { %239 = vmatmul.mubr.msk.f32.vlgmr.msra.gmra.mrb[0].mxu0 %vm143_vm2, %v136_v2 }
 0x18c   :  { %v217_v5 = vpop.f32.mrb[0].mxu0 }
 0x18d   :  { %v218_v6 = vadd.f32 %v217_v5, %v141_v4  ;;  %v240_v7 = vpop.f32.mrb[1].mxu0 }
 0x18f   :  { %221 = vst [vmem:[%s344_s5] sm:$0xff] %v218_v6 }

</bundles_post_ra>
